<compile_context>
chip_gen: v7x
topology: tpu7x:2x2x1
jax: 0.10.0
libtpu: 0.0.40
codegen_flags: <defaults>
</compile_context>

<pallas_src>
import jax
import jax.numpy as jnp
from jax.experimental import pallas as pl
from jax.experimental.pallas import tpu as pltpu

ARCH_DIM = 5
SMALL_BATCH_MIN = 1024   # below this, plain XLA beats the pallas_call fixed cost
TB_MAX = 4096            # batch tile; per-tile VMEM is a few MiB, safe on v5e/v6e/v7x


def _round_up(n, m):
    return ((n + m - 1) // m) * m


def _surrogate_kernel(x_ref,
                      we_ref, be_ref,    # fused encoder (F -> 2H), block-diagonal
                      w1_ref, b1_ref,    # dvn linear 1  (2H -> H)
                      w2_ref, b2_ref,    # dvn linear 2  (H -> H)
                      w3_ref, b3_ref,    # dvn linear 3  (H -> H)
                      wh_ref, bh_ref,    # fused head    (H -> out_pad) = [acc | out | 0]
                      mask_ref,          # (1, out_pad) f32, 1.0 on the two acc lanes
                      o_ref):
    x = x_ref[...]                       # bf16 [TB, F]

    # Hoist bias / mask loads out of the matmul chain (f32).
    be = be_ref[...]
    b1 = b1_ref[...]
    b2 = b2_ref[...]
    b3 = b3_ref[...]
    bh = bh_ref[...]
    m = mask_ref[...]

    def lin(v_bf16, w_ref, b_f32):
        # bf16 MXU matmul with f32 accumulation; bias add in f32.
        return jnp.dot(v_bf16, w_ref[...], preferred_element_type=jnp.float32) + b_f32

    def relu_bf16(v_f32):
        # ReLU in f32, stored narrow: halves intermediate vst/vld traffic + VMEM.
        return jnp.maximum(v_f32, 0.0).astype(jnp.bfloat16)

    # Fused arch/hyp encoders (block-diagonal weight replaces slice+2 matmuls+concat).
    h = relu_bf16(lin(x, we_ref, be))          # [TB, 2H]

    # dvn: three Linear+ReLU; Dropout is identity in eval mode.
    f = relu_bf16(lin(h, w1_ref, b1))
    f = relu_bf16(lin(f, w2_ref, b2))
    f = relu_bf16(lin(f, w3_ref, b3))
    # TODO(synk): training-mode Dropout (dropout_p) omitted; eval-mode identity.

    # Fused acc+out head: single matmul; 100*sigmoid applied to the two acc lanes.
    y = lin(f, wh_ref, bh)                     # f32 [TB, out_pad]
    # 100*sigmoid(y) == 50 + 50*tanh(y/2): one EUP push (no exp+reciprocal).
    sig100 = 50.0 + 50.0 * jnp.tanh(0.5 * y)
    # Blend via precomputed mask (no per-tile iota/compare); padded lanes stay 0.
    o_ref[...] = y + m * (sig100 - y)


def prepare_params(params, arch_dim=ARCH_DIM):
    """Wrapper-side weight fusion + bf16 cast (done once, not per call)."""
    wa, ba = params["wa"], params["ba"]
    whyp, bhyp = params["wh"], params["bh"]
    H = wa.shape[1]
    f_in = arch_dim + whyp.shape[0]
    out_dim = params["wo"].shape[1] + 2
    out_pad = _round_up(out_dim, 8)            # small lane pad; sliced off in wrapper

    # Block-diagonal encoder weight keeps the arch / hyperparameter streams exact.
    w_enc = jnp.zeros((f_in, 2 * H), jnp.float32)
    w_enc = w_enc.at[:arch_dim, :H].set(wa)
    w_enc = w_enc.at[arch_dim:, H:].set(whyp)
    b_enc = jnp.concatenate([ba, bhyp], axis=1)          # (1, 2H)

    # Fused acc+out head, zero-padded to out_pad lanes.
    w_head = jnp.zeros((H, out_pad), jnp.float32)
    w_head = w_head.at[:, :2].set(params["wacc"])
    w_head = w_head.at[:, 2:out_dim].set(params["wo"])
    b_head = jnp.zeros((1, out_pad), jnp.float32)
    b_head = b_head.at[:, :2].set(params["bacc"])
    b_head = b_head.at[:, 2:out_dim].set(params["bo"])

    mask_acc = jnp.zeros((1, out_pad), jnp.float32).at[:, :2].set(1.0)

    bf16 = lambda w: w.astype(jnp.bfloat16)
    return dict(
        we=bf16(w_enc), be=b_enc,
        w1=bf16(params["w1"]), b1=params["b1"],
        w2=bf16(params["w2"]), b2=params["b2"],
        w3=bf16(params["w3"]), b3=params["b3"],
        wh=bf16(w_head), bh=b_head,
        mask_acc=mask_acc,
    )


def _xla_small_batch_forward(x, fused, out_dim):
    """Plain-XLA path for tiny batches; same fused weights / bf16 math as the kernel."""
    xb = x.astype(jnp.bfloat16)
    lin = lambda v, w, b: jnp.dot(v, w, preferred_element_type=jnp.float32) + b
    relu_bf16 = lambda v: jnp.maximum(v, 0.0).astype(jnp.bfloat16)
    h = relu_bf16(lin(xb, fused["we"], fused["be"]))
    f = relu_bf16(lin(h, fused["w1"], fused["b1"]))
    f = relu_bf16(lin(f, fused["w2"], fused["b2"]))
    f = relu_bf16(lin(f, fused["w3"], fused["b3"]))
    y = lin(f, fused["wh"], fused["bh"])
    sig100 = 50.0 + 50.0 * jnp.tanh(0.5 * y)
    y = y + fused["mask_acc"] * (sig100 - y)
    return y[:, :out_dim]


def nnstar_surrogate_forward(x, fused, out_dim, *, force_pallas=False):
    """x: [B, F] float32. fused: output of prepare_params. Returns [B, out_dim] f32."""
    B, f_in = x.shape
    H2 = fused["we"].shape[1]
    H = H2 // 2
    out_pad = fused["wh"].shape[1]

    # Small-batch fallback: at these layer widths a single XLA dot chain is as
    # fast as (or faster than) the pallas_call fixed cost.
    if not force_pallas and B < SMALL_BATCH_MIN:
        return _xla_small_batch_forward(x, fused, out_dim)

    # Batch tile: big enough to amortize per-step overhead, multiple of 8 sublanes.
    B_pad8 = _round_up(B, 8)
    TB = min(TB_MAX, B_pad8)
    # v7x megacore: keep >= 2 grid steps whenever there is more than one 8-row tile.
    if B_pad8 > 8 and pl.cdiv(B, TB) < 2:
        TB = max(8, _round_up(pl.cdiv(B_pad8, 2), 8))
    # No row padding: Pallas masks the ragged last block's out-of-bounds stores.
    grid = (pl.cdiv(B, TB),)

    x_bf16 = x.astype(jnp.bfloat16)

    def resident(shape):
        # Weight/bias/mask blocks = full array, same block every grid step.
        return pl.BlockSpec(shape, lambda i: (0, 0))

    flops = 2 * B * (f_in * H2 + H2 * H + 2 * H * H + H * out_pad)
    bytes_accessed = int(
        x_bf16.size * 2
        + sum(int(v.size) * v.dtype.itemsize for v in fused.values())
        + B * out_pad * 4)
    cost = pl.CostEstimate(flops=int(flops),
                           transcendentals=int(B * out_pad),
                           bytes_accessed=bytes_accessed)

    out = pl.pallas_call(
        _surrogate_kernel,
        out_shape=jax.ShapeDtypeStruct((B, out_pad), jnp.float32),
        grid=grid,
        in_specs=[
            pl.BlockSpec((TB, f_in), lambda i: (i, 0)),
            resident(fused["we"].shape), resident(fused["be"].shape),
            resident(fused["w1"].shape), resident(fused["b1"].shape),
            resident(fused["w2"].shape), resident(fused["b2"].shape),
            resident(fused["w3"].shape), resident(fused["b3"].shape),
            resident(fused["wh"].shape), resident(fused["bh"].shape),
            resident(fused["mask_acc"].shape),
        ],
        out_specs=pl.BlockSpec((TB, out_pad), lambda i: (i, 0)),
        compiler_params=pltpu.CompilerParams(
            dimension_semantics=("parallel",),        # megacore sharding on v7x
            vmem_limit_bytes=32 * 1024 * 1024),       # explicit raise (v5e default 16 MiB)
        cost_estimate=cost,
    )(x_bf16, fused["we"], fused["be"], fused["w1"], fused["b1"],
      fused["w2"], fused["b2"], fused["w3"], fused["b3"],
      fused["wh"], fused["bh"], fused["mask_acc"])

    return out[:, :out_dim]


def init_params(key, input_dim, hidden_dim, out_dim, arch_dim=ARCH_DIM):
    """PyTorch-style (uniform +/- 1/sqrt(fan_in)) init of the layers forward() uses."""
    hyp_dim = input_dim - arch_dim
    H = hidden_dim
    H2 = 2 * hidden_dim

    def linear(key, fan_in, fan_out):
        kw, kb = jax.random.split(key)
        bound = 1.0 / jnp.sqrt(float(fan_in))
        w = jax.random.uniform(kw, (fan_in, fan_out), jnp.float32, -bound, bound)
        b = jax.random.uniform(kb, (1, fan_out), jnp.float32, -bound, bound)
        return w, b

    keys = jax.random.split(key, 7)
    wa, ba = linear(keys[0], arch_dim, H)        # arch_encoding
    wh, bh = linear(keys[1], hyp_dim, H)         # hyp_encoding
    w1, b1 = linear(keys[2], H2, H)              # dvn[0]
    w2, b2 = linear(keys[3], H, H)               # dvn[2]
    w3, b3 = linear(keys[4], H, H)               # dvn[4]
    wo, bo = linear(keys[5], H, out_dim - 2)     # out
    wacc, bacc = linear(keys[6], H, 2)           # acc

    return dict(wa=wa, ba=ba, wh=wh, bh=bh,
                w1=w1, b1=b1, w2=w2, b2=b2, w3=w3, b3=b3,
                wo=wo, bo=bo, wacc=wacc, bacc=bacc)


def reference_forward(x, params, arch_dim=ARCH_DIM):
    """Pure-JAX f32 reference mirroring the PyTorch forward (eval mode)."""
    arch_in = x[:, :arch_dim]
    hyp_in = x[:, arch_dim:]
    relu = lambda v: jnp.maximum(v, 0.0)
    arch_emb = relu(arch_in @ params["wa"] + params["ba"])
    hyp_emb = relu(hyp_in @ params["wh"] + params["bh"])
    h = jnp.concatenate([arch_emb, hyp_emb], axis=1)
    f = relu(h @ params["w1"] + params["b1"])
    f = relu(f @ params["w2"] + params["b2"])
    f = relu(f @ params["w3"] + params["b3"])
    start_end = jax.nn.sigmoid(f @ params["wacc"] + params["bacc"])
    control_points = f @ params["wo"] + params["bo"]
    return jnp.concatenate([100.0 * start_end, control_points], axis=1)


if __name__ == "__main__":
    # Small shapes consistent with the module:
    #   input_shape = (B, 13) -> arch features = 5, hyperparam features = 8
    #   hidden_dim = 32, out_dim = 6  (so out -> 4 cols, acc -> 2 cols)
    B, INPUT_DIM, HIDDEN, OUT_DIM = 8, 13, 32, 6

    key = jax.random.PRNGKey(0)
    kx, kp, kx2 = jax.random.split(key, 3)
    params = init_params(kp, INPUT_DIM, HIDDEN, OUT_DIM)
    fused = prepare_params(params)

    # bf16 weights/inputs vs. f32 reference -> loosened tolerance (values reach ~100).
    ATOL, RTOL = 0.5, 2e-2

    # 1) Tiny batch through the Pallas kernel (single 8-row tile).
    x = jax.random.normal(kx, (B, INPUT_DIM), jnp.float32)
    y = jax.block_until_ready(
        nnstar_surrogate_forward(x, fused, OUT_DIM, force_pallas=True))
    y_ref = reference_forward(x, params)
    assert y.shape == (B, OUT_DIM)
    assert jnp.allclose(y, y_ref, atol=ATOL, rtol=RTOL), (
        f"mismatch vs. reference, max abs diff = {float(jnp.max(jnp.abs(y - y_ref)))}")

    # 2) Ragged multi-tile batch (>= 2 grid steps + masked last block).
    B2 = 203
    x2 = jax.random.normal(kx2, (B2, INPUT_DIM), jnp.float32)
    y2 = jax.block_until_ready(
        nnstar_surrogate_forward(x2, fused, OUT_DIM, force_pallas=True))
    y2_ref = reference_forward(x2, params)
    assert y2.shape == (B2, OUT_DIM)
    assert jnp.allclose(y2, y2_ref, atol=ATOL, rtol=RTOL), (
        f"mismatch vs. reference (ragged), max abs diff = "
        f"{float(jnp.max(jnp.abs(y2 - y2_ref)))}")

    # 3) Small-batch XLA fallback path (default behavior for B < SMALL_BATCH_MIN).
    y3 = jax.block_until_ready(nnstar_surrogate_forward(x, fused, OUT_DIM))
    assert jnp.allclose(y3, y_ref, atol=ATOL, rtol=RTOL)

    print("KERNEL_OK")
</pallas_src>

<mosaic_0001>
module attributes {stable_mosaic.version = 11 : i64} {
  func.func @_surrogate_kernel(%arg0: i32, %arg1: memref<8x13xbf16, #tpu.memory_space<vmem>>, %arg2: memref<13x64xbf16, #tpu.memory_space<vmem>>, %arg3: memref<1x64xf32, #tpu.memory_space<vmem>>, %arg4: memref<64x32xbf16, #tpu.memory_space<vmem>>, %arg5: memref<1x32xf32, #tpu.memory_space<vmem>>, %arg6: memref<32x32xbf16, #tpu.memory_space<vmem>>, %arg7: memref<1x32xf32, #tpu.memory_space<vmem>>, %arg8: memref<32x32xbf16, #tpu.memory_space<vmem>>, %arg9: memref<1x32xf32, #tpu.memory_space<vmem>>, %arg10: memref<32x8xbf16, #tpu.memory_space<vmem>>, %arg11: memref<1x8xf32, #tpu.memory_space<vmem>>, %arg12: memref<1x8xf32, #tpu.memory_space<vmem>>, %arg13: memref<8x8xf32, #tpu.memory_space<vmem>>) attributes {dimension_semantics = [#tpu.dimension_semantics<parallel>], iteration_bounds = array<i64: 1>, scalar_prefetch = 0 : i64, scratch_operands = 0 : i64, tpu.core_type = #tpu.core_type<tc>, window_params = [{transform_indices = @transform_0, window_bounds = array<i64: 8, 13>}, {pipeline_mode = #tpu.pipeline_mode<synchronous>, transform_indices = @transform_1, window_bounds = array<i64: 13, 64>}, {pipeline_mode = #tpu.pipeline_mode<synchronous>, transform_indices = @transform_2, window_bounds = array<i64: 1, 64>}, {pipeline_mode = #tpu.pipeline_mode<synchronous>, transform_indices = @transform_3, window_bounds = array<i64: 64, 32>}, {pipeline_mode = #tpu.pipeline_mode<synchronous>, transform_indices = @transform_4, window_bounds = array<i64: 1, 32>}, {pipeline_mode = #tpu.pipeline_mode<synchronous>, transform_indices = @transform_5, window_bounds = array<i64: 32, 32>}, {pipeline_mode = #tpu.pipeline_mode<synchronous>, transform_indices = @transform_6, window_bounds = array<i64: 1, 32>}, {pipeline_mode = #tpu.pipeline_mode<synchronous>, transform_indices = @transform_7, window_bounds = array<i64: 32, 32>}, {pipeline_mode = #tpu.pipeline_mode<synchronous>, transform_indices = @transform_8, window_bounds = array<i64: 1, 32>}, {pipeline_mode = #tpu.pipeline_mode<synchronous>, transform_indices = @transform_9, window_bounds = array<i64: 32, 8>}, {pipeline_mode = #tpu.pipeline_mode<synchronous>, transform_indices = @transform_10, window_bounds = array<i64: 1, 8>}, {pipeline_mode = #tpu.pipeline_mode<synchronous>, transform_indices = @transform_11, window_bounds = array<i64: 1, 8>}, {transform_indices = @transform_12, window_bounds = array<i64: 8, 8>}]} {
    %c0 = arith.constant 0 : index
    %c0_0 = arith.constant 0 : index
    %0 = vector.load %arg1[%c0, %c0_0] : memref<8x13xbf16, #tpu.memory_space<vmem>>, vector<8x13xbf16>
    %c0_1 = arith.constant 0 : index
    %c0_2 = arith.constant 0 : index
    %1 = vector.load %arg3[%c0_1, %c0_2] : memref<1x64xf32, #tpu.memory_space<vmem>>, vector<1x64xf32>
    %c0_3 = arith.constant 0 : index
    %c0_4 = arith.constant 0 : index
    %2 = vector.load %arg5[%c0_3, %c0_4] : memref<1x32xf32, #tpu.memory_space<vmem>>, vector<1x32xf32>
    %c0_5 = arith.constant 0 : index
    %c0_6 = arith.constant 0 : index
    %3 = vector.load %arg7[%c0_5, %c0_6] : memref<1x32xf32, #tpu.memory_space<vmem>>, vector<1x32xf32>
    %c0_7 = arith.constant 0 : index
    %c0_8 = arith.constant 0 : index
    %4 = vector.load %arg9[%c0_7, %c0_8] : memref<1x32xf32, #tpu.memory_space<vmem>>, vector<1x32xf32>
    %c0_9 = arith.constant 0 : index
    %c0_10 = arith.constant 0 : index
    %5 = vector.load %arg11[%c0_9, %c0_10] : memref<1x8xf32, #tpu.memory_space<vmem>>, vector<1x8xf32>
    %c0_11 = arith.constant 0 : index
    %c0_12 = arith.constant 0 : index
    %6 = vector.load %arg12[%c0_11, %c0_12] : memref<1x8xf32, #tpu.memory_space<vmem>>, vector<1x8xf32>
    %c0_13 = arith.constant 0 : index
    %c0_14 = arith.constant 0 : index
    %7 = vector.load %arg2[%c0_13, %c0_14] : memref<13x64xbf16, #tpu.memory_space<vmem>>, vector<13x64xbf16>
    %cst = arith.constant dense<0.000000e+00> : vector<8x64xf32>
    %8 = tpu.matmul %0, %7, %cst {dimension_numbers = #tpu.dot_dimension_numbers<[1], [0], [0], [1], [0, 0, 1, 1], [], []>} : vector<8x13xbf16>, vector<13x64xbf16>, vector<8x64xf32> -> vector<8x64xf32>
    %9 = vector.broadcast %1 : vector<1x64xf32> to vector<8x64xf32>
    %10 = arith.addf %8, %9 : vector<8x64xf32>
    %cst_15 = arith.constant 0.000000e+00 : f32
    %11 = vector.broadcast %cst_15 : f32 to vector<8x64xf32>
    %12 = arith.maximumf %10, %11 : vector<8x64xf32>
    %13 = arith.truncf %12 : vector<8x64xf32> to vector<8x64xbf16>
    %c0_16 = arith.constant 0 : index
    %c0_17 = arith.constant 0 : index
    %14 = vector.load %arg4[%c0_16, %c0_17] : memref<64x32xbf16, #tpu.memory_space<vmem>>, vector<64x32xbf16>
    %cst_18 = arith.constant dense<0.000000e+00> : vector<8x32xf32>
    %15 = tpu.matmul %13, %14, %cst_18 {dimension_numbers = #tpu.dot_dimension_numbers<[1], [0], [0], [1], [0, 0, 1, 1], [], []>} : vector<8x64xbf16>, vector<64x32xbf16>, vector<8x32xf32> -> vector<8x32xf32>
    %16 = vector.broadcast %2 : vector<1x32xf32> to vector<8x32xf32>
    %17 = arith.addf %15, %16 : vector<8x32xf32>
    %cst_19 = arith.constant 0.000000e+00 : f32
    %18 = vector.broadcast %cst_19 : f32 to vector<8x32xf32>
    %19 = arith.maximumf %17, %18 : vector<8x32xf32>
    %20 = arith.truncf %19 : vector<8x32xf32> to vector<8x32xbf16>
    %c0_20 = arith.constant 0 : index
    %c0_21 = arith.constant 0 : index
    %21 = vector.load %arg6[%c0_20, %c0_21] : memref<32x32xbf16, #tpu.memory_space<vmem>>, vector<32x32xbf16>
    %cst_22 = arith.constant dense<0.000000e+00> : vector<8x32xf32>
    %22 = tpu.matmul %20, %21, %cst_22 {dimension_numbers = #tpu.dot_dimension_numbers<[1], [0], [0], [1], [0, 0, 1, 1], [], []>} : vector<8x32xbf16>, vector<32x32xbf16>, vector<8x32xf32> -> vector<8x32xf32>
    %23 = vector.broadcast %3 : vector<1x32xf32> to vector<8x32xf32>
    %24 = arith.addf %22, %23 : vector<8x32xf32>
    %cst_23 = arith.constant 0.000000e+00 : f32
    %25 = vector.broadcast %cst_23 : f32 to vector<8x32xf32>
    %26 = arith.maximumf %24, %25 : vector<8x32xf32>
    %27 = arith.truncf %26 : vector<8x32xf32> to vector<8x32xbf16>
    %c0_24 = arith.constant 0 : index
    %c0_25 = arith.constant 0 : index
    %28 = vector.load %arg8[%c0_24, %c0_25] : memref<32x32xbf16, #tpu.memory_space<vmem>>, vector<32x32xbf16>
    %cst_26 = arith.constant dense<0.000000e+00> : vector<8x32xf32>
    %29 = tpu.matmul %27, %28, %cst_26 {dimension_numbers = #tpu.dot_dimension_numbers<[1], [0], [0], [1], [0, 0, 1, 1], [], []>} : vector<8x32xbf16>, vector<32x32xbf16>, vector<8x32xf32> -> vector<8x32xf32>
    %30 = vector.broadcast %4 : vector<1x32xf32> to vector<8x32xf32>
    %31 = arith.addf %29, %30 : vector<8x32xf32>
    %cst_27 = arith.constant 0.000000e+00 : f32
    %32 = vector.broadcast %cst_27 : f32 to vector<8x32xf32>
    %33 = arith.maximumf %31, %32 : vector<8x32xf32>
    %34 = arith.truncf %33 : vector<8x32xf32> to vector<8x32xbf16>
    %c0_28 = arith.constant 0 : index
    %c0_29 = arith.constant 0 : index
    %35 = vector.load %arg10[%c0_28, %c0_29] : memref<32x8xbf16, #tpu.memory_space<vmem>>, vector<32x8xbf16>
    %cst_30 = arith.constant dense<0.000000e+00> : vector<8x8xf32>
    %36 = tpu.matmul %34, %35, %cst_30 {dimension_numbers = #tpu.dot_dimension_numbers<[1], [0], [0], [1], [0, 0, 1, 1], [], []>} : vector<8x32xbf16>, vector<32x8xbf16>, vector<8x8xf32> -> vector<8x8xf32>
    %37 = vector.broadcast %5 : vector<1x8xf32> to vector<8x8xf32>
    %38 = arith.addf %36, %37 : vector<8x8xf32>
    %cst_31 = arith.constant 5.000000e-01 : f32
    %39 = vector.broadcast %cst_31 : f32 to vector<8x8xf32>
    %40 = arith.mulf %39, %38 : vector<8x8xf32>
    %41 = math.tanh %40 : vector<8x8xf32>
    %cst_32 = arith.constant 5.000000e+01 : f32
    %42 = vector.broadcast %cst_32 : f32 to vector<8x8xf32>
    %43 = arith.mulf %42, %41 : vector<8x8xf32>
    %cst_33 = arith.constant 5.000000e+01 : f32
    %44 = vector.broadcast %cst_33 : f32 to vector<8x8xf32>
    %45 = arith.addf %44, %43 : vector<8x8xf32>
    %46 = arith.subf %45, %38 : vector<8x8xf32>
    %47 = vector.broadcast %6 : vector<1x8xf32> to vector<8x8xf32>
    %48 = arith.mulf %47, %46 : vector<8x8xf32>
    %49 = arith.addf %38, %48 : vector<8x8xf32>
    %c0_34 = arith.constant 0 : index
    %c0_35 = arith.constant 0 : index
    %50 = vector.load %arg13[%c0_34, %c0_35] : memref<8x8xf32, #tpu.memory_space<vmem>>, vector<8x8xf32>
    tpu.vector_store %arg13[%c0_34, %c0_35], %49 {strides = array<i32>} : memref<8x8xf32, #tpu.memory_space<vmem>>, vector<8x8xf32>,
    return
  }
  func.func @transform_0(%arg0: i32) -> (i32, i32) {
    %c0_i32 = arith.constant 0 : i32
    %c0_i32_0 = arith.constant 0 : i32
    return %arg0, %c0_i32 : i32, i32
  }
  func.func @transform_1(%arg0: i32) -> (i32, i32) {
    %c0_i32 = arith.constant 0 : i32
    %c0_i32_0 = arith.constant 0 : i32
    %c0_i32_1 = arith.constant 0 : i32
    return %c0_i32, %c0_i32_0 : i32, i32
  }
  func.func @transform_2(%arg0: i32) -> (i32, i32) {
    %c0_i32 = arith.constant 0 : i32
    %c0_i32_0 = arith.constant 0 : i32
    %c0_i32_1 = arith.constant 0 : i32
    return %c0_i32, %c0_i32_0 : i32, i32
  }
  func.func @transform_3(%arg0: i32) -> (i32, i32) {
    %c0_i32 = arith.constant 0 : i32
    %c0_i32_0 = arith.constant 0 : i32
    %c0_i32_1 = arith.constant 0 : i32
    return %c0_i32, %c0_i32_0 : i32, i32
  }
  func.func @transform_4(%arg0: i32) -> (i32, i32) {
    %c0_i32 = arith.constant 0 : i32
    %c0_i32_0 = arith.constant 0 : i32
    %c0_i32_1 = arith.constant 0 : i32
    return %c0_i32, %c0_i32_0 : i32, i32
  }
  func.func @transform_5(%arg0: i32) -> (i32, i32) {
    %c0_i32 = arith.constant 0 : i32
    %c0_i32_0 = arith.constant 0 : i32
    %c0_i32_1 = arith.constant 0 : i32
    return %c0_i32, %c0_i32_0 : i32, i32
  }
  func.func @transform_6(%arg0: i32) -> (i32, i32) {
    %c0_i32 = arith.constant 0 : i32
    %c0_i32_0 = arith.constant 0 : i32
    %c0_i32_1 = arith.constant 0 : i32
    return %c0_i32, %c0_i32_0 : i32, i32
  }
  func.func @transform_7(%arg0: i32) -> (i32, i32) {
    %c0_i32 = arith.constant 0 : i32
    %c0_i32_0 = arith.constant 0 : i32
    %c0_i32_1 = arith.constant 0 : i32
    return %c0_i32, %c0_i32_0 : i32, i32
  }
  func.func @transform_8(%arg0: i32) -> (i32, i32) {
    %c0_i32 = arith.constant 0 : i32
    %c0_i32_0 = arith.constant 0 : i32
    %c0_i32_1 = arith.constant 0 : i32
    return %c0_i32, %c0_i32_0 : i32, i32
  }
  func.func @transform_9(%arg0: i32) -> (i32, i32) {
    %c0_i32 = arith.constant 0 : i32
    %c0_i32_0 = arith.constant 0 : i32
    %c0_i32_1 = arith.constant 0 : i32
    return %c0_i32, %c0_i32_0 : i32, i32
  }
  func.func @transform_10(%arg0: i32) -> (i32, i32) {
    %c0_i32 = arith.constant 0 : i32
    %c0_i32_0 = arith.constant 0 : i32
    %c0_i32_1 = arith.constant 0 : i32
    return %c0_i32, %c0_i32_0 : i32, i32
  }
  func.func @transform_11(%arg0: i32) -> (i32, i32) {
    %c0_i32 = arith.constant 0 : i32
    %c0_i32_0 = arith.constant 0 : i32
    %c0_i32_1 = arith.constant 0 : i32
    return %c0_i32, %c0_i32_0 : i32, i32
  }
  func.func @transform_12(%arg0: i32) -> (i32, i32) {
    %c0_i32 = arith.constant 0 : i32
    %c0_i32_0 = arith.constant 0 : i32
    return %arg0, %c0_i32 : i32, i32
  }
}

</mosaic_0001>

<bundles_post_ra>
// kernel: tpu_custom_call.1
= control target key start
LH: loop header
LB: loop body
LE: loop exit
PB: predicated region body
PF: predicated region fallthrough
CT: control target
= control target key end

     0   :  { %vm67_vm0 = vcmask 1045504   ;;  %v550_v0 = vmov 0.0   ;;  %vm68_vm1 = vcmask 1046528   ;;  %v551_v2 = vmov 65535   ;;  %s709_s0 = inlined_call_operand.vmem [shape: bf16[8,13], index: 0, kind: input, shape index: {}]   ;;  %s710_s1 = inlined_call_operand.vmem [shape: bf16[13,64], index: 1, kind: input, shape index: {}]   ;;  %s711_s2 = inlined_call_operand.vmem [shape: f32[1,64], index: 2, kind: input, shape index: {}]   ;;  %s712_s3 = inlined_call_operand.vmem [shape: bf16[64,32], index: 3, kind: input, shape index: {}]   ;;  %s713_s4 = inlined_call_operand.vmem [shape: f32[1,32], index: 4, kind: input, shape index: {}]   ;;  %s714_s5 = inlined_call_operand.vmem [shape: bf16[32,32], index: 5, kind: input, shape index: {}]   ;;  %s715_s6 = inlined_call_operand.vmem [shape: f32[1,32], index: 6, kind: input, shape index: {}]   ;;  %s716_s7 = inlined_call_operand.vmem [shape: bf16[32,32], index: 7, kind: input, shape index: {}]   ;;  %s717_s8 = inlined_call_operand.vmem [shape: f32[1,32], index: 8, kind: input, shape index: {}]   ;;  %s718_s9 = inlined_call_operand.vmem [shape: bf16[32,8], index: 9, kind: input, shape index: {}]   ;;  %s719_s10 = inlined_call_operand.vmem [shape: f32[1,8], index: 10, kind: input, shape index: {}]   ;;  %s720_s11 = inlined_call_operand.vmem [shape: f32[1,8], index: 11, kind: input, shape index: {}]   ;;  %s721_s12 = inlined_call_operand.hbm [shape: f32[8,8], index: 12, kind: output, shape index: {}]  }
   0x1   :  { %467 = vmatprep.subr.bf16.mxu0 %v550_v0  ;;  %v513_v1 = vld [vmem:[%s710_s1] sm:$0x7f]   ;;  %473 = vmatprep.subr.bf16.mxu1 %v550_v0  ;;  %v69_v3 = vsel %vm67_vm0, 4294967295, %v551_v2  ;;  %vm552_vm2 = vmmov 0   ;;  %vm63_vm3 = vcmask 105472   ;;  %v515_v8 = vld [vmem:[%s712_s3 + $0x8] sm:$0xff]  }
   0x2   :  { %469 = vmatprep.mubr.msk.bf16.mxu0 %vm552_vm2, %v550_v0  ;;  %v514_v4 = vld [vmem:[%s712_s3] sm:$0xff]   ;;  %481 = vmatprep.mubr.msk.bf16.mxu1 %vm552_vm2, %v550_v0  ;;  %v70_v5 = vsel %vm68_vm1, %v69_v3, 0 }
   0x3   :  { %v72_v6 = vand.u32 %v513_v1, %v70_v5  ;;  %v43_v7 = vld [vmem:[%s709_s0] sm:$0xf]  ;;  %474 = vmatpush3.bf16.msra.mxu1 %v514_v4 }
   0x4   :  { %475 = vmatprep.subr.bf16.mxu1 %v550_v0 }
   0x5   :  { %468 = vmatpush3.bf16.msra.mxu0 %v72_v6 }
   0x6   :  { %485 = vmatprep.subr.bf16.mxu0 %v550_v0 }
   0x7   :  { %476 = vmatpush3.bf16.msra.mxu1 %v515_v8 }
   0x8   :  { %470 = vmatmul.mubr.msk.bf16.vlgmr.msra.gmra.mrb[0].mxu0 %vm63_vm3, %v43_v7  ;;  %477 = vmatprep.subr.bf16.mxu1 %v550_v0 }
   0x9   :  { %489 = vmatprep.mubr.msk.bf16.mxu0 %vm552_vm2, %v550_v0 }
   0xa   :  { %17 = vsyncpa [#allocation3], 0  ;;  %v516_v9 = vld [vmem:[%s712_s3 + $0x10] sm:$0xff]   ;;  %v517_v10 = vld [vmem:[%s712_s3 + $0x18] sm:$0xff]   ;;  %vm154_vm4 = vcmask 523264   ;;  %vm222_vm5 = vcmask 261120  }
   0xb   :  { %478 = vmatpush3.bf16.msra.mxu1 %v516_v9  ;;  %v518_v11 = vld [vmem:[%s714_s5] sm:$0xff]   ;;  %v519_v20 = vld [vmem:[%s714_s5 + $0x8] sm:$0xff]   ;;  %s553_s0 = smov [#allocation2]   ;;  %vm413_vm6 = vcmask 64512  }
   0xc   :  { %479 = vmatprep.subr.bf16.mxu1 %v550_v0  ;;  %486 = vmatpush3.bf16.msra.mxu0 %v518_v11  ;;  %v429_v12 = vld [vmem:[%s711_s2] ss:$0 sm:$0xff]  ;;  %v521_v30 = vld [vmem:[%s716_s7 + $0x8] sm:$0xff]   ;;  %s421_s28 = sshll.u32 %s553_s0, 4  ;;  %s422_s28 = int_to_ptr.vmem [resolvable:$true] %s421_s28 }
   0xd   :  { %487 = vmatprep.subr.bf16.mxu0 %v550_v0  ;;  %v432_v21 = vld [vmem:[%s713_s4] ss:$0 sm:$0xff]  ;;  %v523_v40 = vld [vmem:[%s718_s9 + $0x8] sm:$0xff]   ;;  %p531_p1 = scmp.lt.s32.totalorder %s422_s28, %s422_s28 }
   0xe   :  { %v520_v28 = vld [vmem:[%s716_s7] sm:$0xff]  }
   0xf   :  { %480 = vmatpush3.bf16.msra.mxu1 %v517_v10  ;;  %v522_v31 = vld [vmem:[%s718_s9] sm:$0xff]  }
  0x10   :  { %501 = vmatprep.subr.bf16.mxu1 %v550_v0  ;;  %488 = vmatpush3.bf16.msra.mxu0 %v519_v20  ;;  %v438_v32 = vld [vmem:[%s715_s6] ss:$0 sm:$0xff] }
  0x11   :  { %493 = vmatprep.subr.bf16.mxu0 %v550_v0  ;;  %v442_v41 = vld [vmem:[%s717_s8] ss:$0 sm:$0xff] }
  0x12   :  { %v446_v49 = vld [vmem:[%s719_s10] ss:$0 sm:$0xff]  ;;  %s526_s10 = scalar_lea.vmem %s422_s28, 128 }
  0x13   :  { %v450_v59 = vld [vmem:[%s720_s11] ss:$0 sm:$0xff]  ;;  %p527_p0 = scmp.ne.s32.totalorder %s422_s28, %s526_s10  ;;  %p532_p2 = scmp.lt.s32.totalorder %s526_s10, %s526_s10 }
  0x15   :  { %p533_p3 = por %p532_p2, %p531_p1 }
  0x17   :  { %p534_p4 = pnand %p533_p3, %p527_p0 }
  0xdb   :  { %v108_v13 = vpop.f32.mrb[0].mxu0 }
  0xdc   :  { %v109_v14 = vadd.f32 %v429_v12, %v108_v13  ;;  %v471_v15 = vpop.f32.mrb[1].mxu0 }
  0xdd   :  { %v111_v16 = vpop.f32.mrb[2].mxu0 }
  0xde   :  { %v114_v17 = vmax.f32 %v109_v14, 0.0  ;;  %v472_v18 = vpop.f32.mrb[3].mxu0 }
  0xe0   :  { %v115_v19 = vpack.c.bf16 %v114_v17, %v114_v17 }
  0xe2   :  { %482 = vmatmul.mubr.msk.bf16.vlgmr.msra.gmra.mrb[0].mxu1 %vm154_vm4, %v115_v19 }
  0xe3   :  { %505 = vmatprep.mubr.msk.bf16.mxu1 %vm552_vm2, %v550_v0  ;;  %502 = vmatpush3.bf16.msra.mxu1 %v522_v31 }
  0xe4   :  { %503 = vmatprep.subr.bf16.mxu1 %v550_v0 }
  0xe7   :  { %504 = vmatpush3.bf16.msra.mxu1 %v523_v40 }
 0x1b5   :  { %v192_v22 = vpop.f32.mrb[0].mxu1 }
 0x1b6   :  { %v193_v23 = vadd.f32 %v432_v21, %v192_v22  ;;  %v483_v24 = vpop.f32.mrb[1].mxu1 }
 0x1b7   :  { %v195_v25 = vpop.f32.mrb[2].mxu1 }
 0x1b8   :  { %v198_v26 = vmax.f32 %v193_v23, 0.0  ;;  %v484_v27 = vpop.f32.mrb[3].mxu1 }
 0x1ba   :  { %v199_v29 = vpack.c.bf16 %v198_v26, %v198_v26 }
 0x1bc   :  { %490 = vmatmul.mubr.msk.bf16.vlgmr.msra.gmra.mrb[4].mxu0 %vm222_vm5, %v199_v29 }
 0x1bd   :  { %494 = vmatpush3.bf16.msra.mxu0 %v520_v28  ;;  %497 = vmatprep.mubr.msk.bf16.mxu0 %vm552_vm2, %v550_v0 }
 0x1be   :  { %495 = vmatprep.subr.bf16.mxu0 %v550_v0 }
 0x1c1   :  { %496 = vmatpush3.bf16.msra.mxu0 %v521_v30 }
 0x28f   :  { %v260_v33 = vpop.f32.mrb[4].mxu0 }
 0x290   :  { %v261_v34 = vadd.f32 %v438_v32, %v260_v33  ;;  %v491_v35 = vpop.f32.mrb[5].mxu0 }
 0x291   :  { %v263_v36 = vpop.f32.mrb[6].mxu0 }
 0x292   :  { %v266_v37 = vmax.f32 %v261_v34, 0.0  ;;  %v492_v38 = vpop.f32.mrb[7].mxu0 }
 0x294   :  { %v267_v39 = vpack.c.bf16 %v266_v37, %v266_v37 }
 0x296   :  { %498 = vmatmul.mubr.msk.bf16.vlgmr.msra.gmra.mrb[8].mxu0 %vm222_vm5, %v267_v39 }
 0x369   :  { %v327_v42 = vpop.f32.mrb[8].mxu0 }
 0x36a   :  { %v328_v43 = vadd.f32 %v442_v41, %v327_v42  ;;  %v499_v44 = vpop.f32.mrb[9].mxu0 }
 0x36b   :  { %v330_v45 = vpop.f32.mrb[10].mxu0 }
 0x36c   :  { %v333_v46 = vmax.f32 %v328_v43, 0.0  ;;  %v500_v47 = vpop.f32.mrb[11].mxu0 }
 0x36e   :  { %v334_v48 = vpack.c.bf16 %v333_v46, %v333_v46 }
 0x370   :  { %506 = vmatmul.mubr.msk.bf16.vlgmr.msra.gmra.mrb[4].mxu1 %vm222_vm5, %v334_v48 }
 0x443   :  { %v394_v50 = vpop.f32.mrb[4].mxu1 }
 0x444   :  { %v395_v51 = vadd.f32 %v446_v49, %v394_v50  ;;  %v507_v52 = vpop.f32.mrb[5].mxu1 }
 0x445   :  { %v397_v53 = vpop.f32.mrb[6].mxu1 }
 0x446   :  { %v400_v54 = vmul.f32 0.5, %v395_v51  ;;  %v508_v55 = vpop.f32.mrb[7].mxu1 }
 0x448   :  { %524 = vtanh.f32 %v400_v54 }
 0x452   :  { %v525_v56 = vpop.eup %524 }
 0x453   :  { %v402_v57 = vmul.f32 50.0, %v525_v56 }
 0x455   :  { %v403_v58 = vadd.f32 50.0, %v402_v57 }
 0x457   :  { %v404_v60 = vsub.f32 %v403_v58, %v395_v51 }
 0x459   :  { %v411_v61 = vmul.f32 %v450_v59, %v404_v60 }
 0x45b   :  { %v412_v62 = vadd.f32 %v411_v61, %v395_v51 }
 0x45d   :  { %414 = vst.msk [vmem:[#allocation2] sm:$0xff] %vm413_vm6, %v412_v62 }
 0x45e   :  { %537 = shalt.err (!%p534_p4)
}
 0x45f   :  { %s538_s13 = scalar_lea.hbm %s721_s12, 128 }
 0x460   :  { %p539_p5 = scmp.ne.s32.totalorder %s721_s12, %s538_s13  ;;  %p542_p6 = scmp.lt.u32.totalorder %s538_s13, %s721_s12 }
 0x462   :  { %p544_p7 = pnand %p542_p6, %p539_p5 }
 0x464   :  { %547 = shalt.err (!%p544_p7)
}
 0x465   :  { %424 = dma.vmem_to_hbm [thread:$0]  %s422_s28, 128, %s721_s12, [#allocation3]  }
 0x466   :  { %548 = dma.done.wait [#allocation3], 128  }
 0x467   :  { %549 = vsyncadd [#allocation3], 4294967168 }
 0x468   :  { %428 = vsyncpa [#allocation3], 1 }

</bundles_post_ra>
